<compile_context>
chip_gen: v7x
topology: tpu7x:2x2x1
jax: 0.10.0
libtpu: 0.0.40
codegen_flags: <defaults>
</compile_context>

<pallas_src>
import numpy as np
import jax
import jax.numpy as jnp
from jax.experimental import pallas as pl
from jax.experimental.pallas import tpu as pltpu


def _round_up(x: int, m: int) -> int:
    return ((x + m - 1) // m) * m


def make_mdn_forward(input_size: int, num_gaussian: int, output_size: int,
                     tm_max: int = 4096, pallas_min_batch: int = 128):
    """Returns (init_params, forward_fn) reproducing MixtureDensityHead.forward."""

    G = num_gaussian
    O = output_size
    GO = G * O
    inv_g = 1.0 / float(G)
    # self.bias = linspace(0, 1, G).reshape(1, G, 1)
    g_bias = jnp.linspace(0.0, 1.0, G, dtype=jnp.float32).reshape(1, G, 1)

    # ---------------- Pallas kernel: pi = x @ w_pi + b_pi -----------------
    def pi_kernel(x_ref, wpi_ref, bpi_ref, pi_ref):
        pi_ref[...] = (jnp.dot(x_ref[...], wpi_ref[...],
                               preferred_element_type=jnp.float32)
                       + bpi_ref[...]).astype(pi_ref.dtype)

    def _pi_pallas(x2d, w_pi, b_pi):
        batch = x2d.shape[0]

        # Tile selection: large tiles (mem/overhead-bound kernel) but keep the
        # grid >= 2 steps when possible so both v7x TensorCores are used.
        if batch <= 2 * tm_max:
            tm = min(tm_max, max(8, _round_up(pl.cdiv(batch, 2), 8)))
        else:
            tm = tm_max
        tm = min(tm, batch)   # tm == batch => full-extent block (always legal)

        grid = (pl.cdiv(batch, tm),)   # ragged trailing block handled by Pallas

        return pl.pallas_call(
            pi_kernel,
            out_shape=jax.ShapeDtypeStruct((batch, G), jnp.float32),
            grid=grid,
            in_specs=[
                pl.BlockSpec((tm, input_size), lambda i: (i, 0)),   # x tile
                pl.BlockSpec((input_size, G), lambda i: (0, 0)),    # w_pi
                pl.BlockSpec((1, G), lambda i: (0, 0)),             # b_pi
            ],
            out_specs=pl.BlockSpec((tm, G), lambda i: (i, 0)),
            compiler_params=pltpu.CompilerParams(
                dimension_semantics=("parallel",)),
        )(x2d, w_pi, b_pi)

    # ---------------- Parameter init (matches nn.Linear layout) -----------
    def init_params(key):
        kd = jax.random.split(key, 6)
        bound = 1.0 / np.sqrt(input_size)
        params = dict(
            w_pi=jax.random.uniform(kd[0], (input_size, G),
                                    jnp.float32, -bound, bound),
            b_pi=jax.random.uniform(kd[1], (1, G),
                                    jnp.float32, -bound, bound),
            # Kept only for module parity / the reference check; their
            # contribution is multiplied by zero in the original module.
            w_sigma=jax.random.uniform(kd[2], (input_size, G),
                                       jnp.float32, -bound, bound),
            b_sigma=jax.random.uniform(kd[3], (1, G),
                                       jnp.float32, -bound, bound),
            w_mu=jax.random.uniform(kd[4], (input_size, GO),
                                    jnp.float32, -bound, bound),
            b_mu=jax.random.uniform(kd[5], (1, GO),
                                    jnp.float32, -bound, bound),
        )
        return params

    # ---------------- Forward --------------------------------------------
    def forward(params, x):
        base_shape = x.shape[:-1]
        x2d = x.reshape(-1, input_size)
        batch = x2d.shape[0]

        if batch < pallas_min_batch:
            # Tiny workload: pallas_call fixed overhead would dominate.
            pi2d = x2d @ params["w_pi"] + params["b_pi"]
        else:
            pi2d = _pi_pallas(x2d, params["w_pi"], params["b_pi"])

        pi = pi2d.reshape(base_shape + (G,))
        # sigma = sigmoid(.)*0 + 1/G  ==  constant 1/G
        sigma = jnp.full(base_shape + (G,), inv_g, dtype=jnp.float32)
        # mu = (.)*0 + bias  ==  bias broadcast over batch and output_size
        mu = jnp.broadcast_to(
            g_bias.reshape((1,) * len(base_shape) + (G, 1)),
            base_shape + (G, O))
        return pi, sigma, mu

    return init_params, forward


def reference_forward(params, x, num_gaussian, output_size):
    """Pure-JAX reference matching the PyTorch module semantics exactly."""
    batch = x.shape[0]
    pi = x @ params["w_pi"] + params["b_pi"]
    sigma = jax.nn.sigmoid(x @ params["w_sigma"] + params["b_sigma"]) * 0.0 \
        + 1.0 / num_gaussian
    mu_lin = (x @ params["w_mu"] + params["b_mu"]).reshape(
        batch, num_gaussian, output_size)
    bias = jnp.linspace(0.0, 1.0, num_gaussian,
                        dtype=jnp.float32).reshape(1, num_gaussian, 1)
    mu = mu_lin * 0.0 + bias
    return pi, sigma, mu


def _check(pi, sigma, mu, params, x, G, O):
    pi_ref, sigma_ref, mu_ref = reference_forward(params, x, G, O)
    batch = x.shape[0]
    assert pi.shape == (batch, G)
    assert sigma.shape == (batch, G)
    assert mu.shape == (batch, G, O)
    np.testing.assert_allclose(np.asarray(pi), np.asarray(pi_ref),
                               rtol=1e-5, atol=1e-5)
    np.testing.assert_allclose(np.asarray(sigma), np.asarray(sigma_ref),
                               rtol=1e-6, atol=1e-6)
    np.testing.assert_allclose(np.asarray(mu), np.asarray(mu_ref),
                               rtol=1e-6, atol=1e-6)


if __name__ == "__main__":
    input_size = 32
    num_gaussian = 8
    output_size = 4

    key = jax.random.PRNGKey(0)
    k_param, k_x1, k_x2, k_x3 = jax.random.split(key, 4)

    init_params, forward = make_mdn_forward(input_size, num_gaussian, output_size)
    params = init_params(k_param)

    # 1) Batch large enough to take the Pallas path (grid of 2 tiles).
    x_big = jax.random.normal(k_x1, (256, input_size), dtype=jnp.float32)
    pi, sigma, mu = forward(params, x_big)
    jax.block_until_ready((pi, sigma, mu))
    _check(pi, sigma, mu, params, x_big, num_gaussian, output_size)

    # 2) Ragged batch (not a multiple of the tile) -> Pallas clips last block.
    x_rag = jax.random.normal(k_x2, (200, input_size), dtype=jnp.float32)
    pi_r, sigma_r, mu_r = forward(params, x_rag)
    jax.block_until_ready((pi_r, sigma_r, mu_r))
    _check(pi_r, sigma_r, mu_r, params, x_rag, num_gaussian, output_size)

    # 3) Tiny batch -> plain-XLA fallback path.
    x_small = jax.random.normal(k_x3, (8, input_size), dtype=jnp.float32)
    pi_s, sigma_s, mu_s = forward(params, x_small)
    jax.block_until_ready((pi_s, sigma_s, mu_s))
    _check(pi_s, sigma_s, mu_s, params, x_small, num_gaussian, output_size)

    print("KERNEL_OK")
</pallas_src>

<mosaic_0001>
module attributes {stable_mosaic.version = 11 : i64} {
  func.func @pi_kernel(%arg0: i32, %arg1: memref<128x32xf32, #tpu.memory_space<vmem>>, %arg2: memref<32x8xf32, #tpu.memory_space<vmem>>, %arg3: memref<1x8xf32, #tpu.memory_space<vmem>>, %arg4: memref<128x8xf32, #tpu.memory_space<vmem>>) attributes {dimension_semantics = [#tpu.dimension_semantics<parallel>], iteration_bounds = array<i64: 2>, scalar_prefetch = 0 : i64, scratch_operands = 0 : i64, tpu.core_type = #tpu.core_type<tc>, window_params = [{transform_indices = @transform_0, window_bounds = array<i64: 128, 32>}, {pipeline_mode = #tpu.pipeline_mode<synchronous>, transform_indices = @transform_1, window_bounds = array<i64: 32, 8>}, {pipeline_mode = #tpu.pipeline_mode<synchronous>, transform_indices = @transform_2, window_bounds = array<i64: 1, 8>}, {transform_indices = @transform_3, window_bounds = array<i64: 128, 8>}]} {
    %c0 = arith.constant 0 : index
    %c0_0 = arith.constant 0 : index
    %0 = vector.load %arg1[%c0, %c0_0] : memref<128x32xf32, #tpu.memory_space<vmem>>, vector<128x32xf32>
    %c0_1 = arith.constant 0 : index
    %c0_2 = arith.constant 0 : index
    %1 = vector.load %arg2[%c0_1, %c0_2] : memref<32x8xf32, #tpu.memory_space<vmem>>, vector<32x8xf32>
    %cst = arith.constant dense<0.000000e+00> : vector<128x8xf32>
    %2 = tpu.matmul %0, %1, %cst {dimension_numbers = #tpu.dot_dimension_numbers<[1], [0], [0], [1], [0, 0, 1, 1], [], []>} : vector<128x32xf32>, vector<32x8xf32>, vector<128x8xf32> -> vector<128x8xf32>
    %c0_3 = arith.constant 0 : index
    %c0_4 = arith.constant 0 : index
    %3 = vector.load %arg3[%c0_3, %c0_4] : memref<1x8xf32, #tpu.memory_space<vmem>>, vector<1x8xf32>
    %4 = vector.broadcast %3 : vector<1x8xf32> to vector<128x8xf32>
    %5 = arith.addf %2, %4 : vector<128x8xf32>
    %c0_5 = arith.constant 0 : index
    %c0_6 = arith.constant 0 : index
    %6 = vector.load %arg4[%c0_5, %c0_6] : memref<128x8xf32, #tpu.memory_space<vmem>>, vector<128x8xf32>
    tpu.vector_store %arg4[%c0_5, %c0_6], %5 {strides = array<i32>} : memref<128x8xf32, #tpu.memory_space<vmem>>, vector<128x8xf32>,
    return
  }
  func.func @transform_0(%arg0: i32) -> (i32, i32) {
    %c0_i32 = arith.constant 0 : i32
    %c0_i32_0 = arith.constant 0 : i32
    return %arg0, %c0_i32 : i32, i32
  }
  func.func @transform_1(%arg0: i32) -> (i32, i32) {
    %c0_i32 = arith.constant 0 : i32
    %c0_i32_0 = arith.constant 0 : i32
    %c0_i32_1 = arith.constant 0 : i32
    return %c0_i32, %c0_i32_0 : i32, i32
  }
  func.func @transform_2(%arg0: i32) -> (i32, i32) {
    %c0_i32 = arith.constant 0 : i32
    %c0_i32_0 = arith.constant 0 : i32
    %c0_i32_1 = arith.constant 0 : i32
    return %c0_i32, %c0_i32_0 : i32, i32
  }
  func.func @transform_3(%arg0: i32) -> (i32, i32) {
    %c0_i32 = arith.constant 0 : i32
    %c0_i32_0 = arith.constant 0 : i32
    return %arg0, %c0_i32 : i32, i32
  }
}

</mosaic_0001>

<bundles_post_ra>
// kernel: tpu_custom_call.1
= control target key start
LH: loop header
LB: loop body
LE: loop exit
PB: predicated region body
PF: predicated region fallthrough
CT: control target
= control target key end

     0   :  { %s596_s12 = smov 0   ;;  %s703_s0 = inlined_call_operand.vmem [shape: f32[256,32], index: 0, kind: input, shape index: {}]   ;;  %s704_s1 = inlined_call_operand.vmem [shape: f32[32,8], index: 1, kind: input, shape index: {}]   ;;  %s705_s2 = inlined_call_operand.vmem [shape: f32[1,8], index: 2, kind: input, shape index: {}]   ;;  %s706_s3 = inlined_call_operand.vmem [shape: f32[256,8], index: 3, kind: output, shape index: {}]  }
   0x1 LB: > { %s468_s13 = sadd.s32 4294967295, %s574_s12   ;;  %p472_p0 = scmp.ge.s32.totalorder %s574_s12, 1  ;;  %s574_s12 = sphi %s596_s12, %s13_s12  }
   0x2   : > { %p138_p1 = scmp.lt.s32.totalorder %s574_s12, 3 }
   0x4   : > { %p139_p2 = pnand %p472_p0, %p138_p1 }
   0x5   : > { %v190_v0 = vld [vmem:[%s704_s1] sm:$0xff] (!%p139_p2)  ;;  %v191_v1 = vld [vmem:[%s704_s1 + $0x8] sm:$0xff] (!%p139_p2)  ;;  %v192_v2 = vld [vmem:[%s704_s1 + $0x10] sm:$0xff] (!%p139_p2)  ;;  %s473_s20 = sshll.u32 (!%p139_p2), %s468_s13, 4  ;;  %vm201_vm0 = vcmask (!%p139_p2), 261120   ;;  %vm395_vm1 = vcmask (!%p139_p2), 64512  }
   0x6   : > { %142 = sbr.rel (%p139_p2) target bundleno = 247 (0xf7), region = 32  ;;  %v548_v3 = vpack.c.bf16 (!%p139_p2), %v191_v1, %v190_v0  ;;  %v193_v4 = vld [vmem:[%s704_s1 + $0x18] sm:$0xff] (!%p139_p2)  ;;  %p163_p3 = scmp.lt.s32.totalorder (!%p139_p2), %s473_s20, 31  ;;  %v477_v22 = vld [vmem:[%s705_s2] ss:$0 sm:$0xff] (!%p139_p2) }
   0x7   : > { %v552_v5 = vpack.c.bf16 (!%p139_p2), %v193_v4, %v192_v2 }
   0x8   : > { %549 = vmatprep.subr.bf16.mxu0 (!%p139_p2), %v548_v3  ;;  %556 = vmatprep.subr.bf16.mxu1 (!%p139_p2), %v548_v3 }
   0x9   : > { %551 = vmatpush3.bf16.msra.mxu0 (!%p139_p2), %v548_v3  ;;  %558 = vmatpush3.bf16.msra.mxu1 (!%p139_p2), %v548_v3 }
   0xa   : > { %553 = vmatprep.subr.bf16.mxu0 (!%p139_p2), %v552_v5  ;;  %557 = vmatprep.subr.bf16.mxu1 (!%p139_p2), %v552_v5 }
   0xd   : > { %s708_s20 = smov (!%p163_p3, %s473_s20), 31  ;;  %555 = vmatpush3.bf16.msra.mxu0 %v552_v5  ;;  %559 = vmatpush3.bf16.msra.mxu1 %v552_v5 }
   0xe   : > { %s474_s23 = sshll.u32 %s708_s20, 3 }
   0xf   : > { %s624_s26 = scalar_lea.vmem %s703_s0, %s474_s23  ;;  %s666_s4 = scalar_lea.vmem %s706_s3, %s474_s23 }
  0x10   : > { %v174_v6 = vld [vmem:[%s624_s26] sm:$0xff]  ;;  %v175_v8 = vld [vmem:[%s624_s26 + $0x8] sm:$0xff]  ;;  %v176_v10 = vld [vmem:[%s624_s26 + $0x10] sm:$0xff] }
  0x11   : > { %v182_v7 = vld [vmem:[%s624_s26 + $0x40] sm:$0xff]  ;;  %v183_v9 = vld [vmem:[%s624_s26 + $0x48] sm:$0xff]  ;;  %524 = vmatprep.mubr.msk.f32.mxu0 %vm201_vm0, %v174_v6  ;;  %v184_v11 = vld [vmem:[%s624_s26 + $0x50] sm:$0xff] }
  0x12   : > { %536 = vmatprep.mubr.msk.f32.mxu1 %vm201_vm0, %v182_v7  ;;  %525 = vmatmul.mubr.msk.f32.vlgmr.msra.gmra.mrb[0].mxu0 %vm201_vm0, %v175_v8  ;;  %v177_v12 = vld [vmem:[%s624_s26 + $0x18] sm:$0xff]  ;;  %v178_v14 = vld [vmem:[%s624_s26 + $0x20] sm:$0xff]  ;;  %v179_v16 = vld [vmem:[%s624_s26 + $0x28] sm:$0xff] }
  0x13   : > { %537 = vmatmul.mubr.msk.f32.vlgmr.msra.gmra.mrb[0].mxu1 %vm201_vm0, %v183_v9  ;;  %527 = vmatprep.mubr.msk.f32.mxu0 %vm201_vm0, %v176_v10  ;;  %v185_v13 = vld [vmem:[%s624_s26 + $0x58] sm:$0xff]  ;;  %v186_v15 = vld [vmem:[%s624_s26 + $0x60] sm:$0xff]  ;;  %v187_v17 = vld [vmem:[%s624_s26 + $0x68] sm:$0xff] }
  0x14   : > { %539 = vmatprep.mubr.msk.f32.mxu1 %vm201_vm0, %v184_v11  ;;  %v180_v18 = vld [vmem:[%s624_s26 + $0x30] sm:$0xff]  ;;  %v181_v20 = vld [vmem:[%s624_s26 + $0x38] sm:$0xff] }
  0x15   : > { %v188_v19 = vld [vmem:[%s624_s26 + $0x70] sm:$0xff]  ;;  %v189_v21 = vld [vmem:[%s624_s26 + $0x78] sm:$0xff] }
  0x16   : > { %528 = vmatmul.mubr.msk.f32.gmra.mrb[2].mxu0 %vm201_vm0, %v177_v12 }
  0x17   : > { %540 = vmatmul.mubr.msk.f32.gmra.mrb[2].mxu1 %vm201_vm0, %v185_v13  ;;  %530 = vmatprep.mubr.msk.f32.mxu0 %vm201_vm0, %v178_v14 }
  0x18   : > { %542 = vmatprep.mubr.msk.f32.mxu1 %vm201_vm0, %v186_v15 }
  0x1a   : > { %531 = vmatmul.mubr.msk.f32.gmra.mrb[4].mxu0 %vm201_vm0, %v179_v16 }
  0x1b   : > { %543 = vmatmul.mubr.msk.f32.gmra.mrb[4].mxu1 %vm201_vm0, %v187_v17  ;;  %533 = vmatprep.mubr.msk.f32.mxu0 %vm201_vm0, %v180_v18 }
  0x1c   : > { %545 = vmatprep.mubr.msk.f32.mxu1 %vm201_vm0, %v188_v19 }
  0x1e   : > { %534 = vmatmul.mubr.msk.f32.gmra.mrb[6].mxu0 %vm201_vm0, %v181_v20 }
  0x1f   : > { %546 = vmatmul.mubr.msk.f32.gmra.mrb[6].mxu1 %vm201_vm0, %v189_v21 }
  0xe5   : > { %v526_v23 = vpop.f32.mrb[0].mxu0 }
  0xe6   : > { %v538_v24 = vpop.f32.mrb[0].mxu1  ;;  %v322_v25 = vadd.f32 %v526_v23, %v477_v22  ;;  %v316_v27 = vpop.f32.mrb[1].mxu0 }
  0xe7   : > { %v362_v26 = vadd.f32 %v538_v24, %v477_v22  ;;  %v356_v28 = vpop.f32.mrb[1].mxu1  ;;  %v317_v29 = vadd.f32 %v477_v22, %v316_v27 }
  0xe8   : > { %v357_v30 = vadd.f32 %v477_v22, %v356_v28  ;;  %397 = vst.msk [vmem:[%s666_s4 + $0x8] sm:$0xff] %vm395_vm1, %v322_v25 }
  0xe9   : > { %405 = vst.msk [vmem:[%s666_s4 + $0x48] sm:$0xff] %vm395_vm1, %v362_v26  ;;  %396 = vst.msk [vmem:[%s666_s4] sm:$0xff] %vm395_vm1, %v317_v29  ;;  %v529_v31 = vpop.f32.mrb[2].mxu0 }
  0xea   : > { %404 = vst.msk [vmem:[%s666_s4 + $0x40] sm:$0xff] %vm395_vm1, %v357_v30  ;;  %v541_v32 = vpop.f32.mrb[2].mxu1  ;;  %v332_v33 = vadd.f32 %v529_v31, %v477_v22  ;;  %v326_v35 = vpop.f32.mrb[3].mxu0 }
  0xeb   : > { %v372_v34 = vadd.f32 %v541_v32, %v477_v22  ;;  %v366_v36 = vpop.f32.mrb[3].mxu1  ;;  %v327_v37 = vadd.f32 %v477_v22, %v326_v35 }
  0xec   : > { %v367_v38 = vadd.f32 %v477_v22, %v366_v36  ;;  %399 = vst.msk [vmem:[%s666_s4 + $0x18] sm:$0xff] %vm395_vm1, %v332_v33 }
  0xed   : > { %407 = vst.msk [vmem:[%s666_s4 + $0x58] sm:$0xff] %vm395_vm1, %v372_v34  ;;  %398 = vst.msk [vmem:[%s666_s4 + $0x10] sm:$0xff] %vm395_vm1, %v327_v37  ;;  %v532_v39 = vpop.f32.mrb[4].mxu0 }
  0xee   : > { %406 = vst.msk [vmem:[%s666_s4 + $0x50] sm:$0xff] %vm395_vm1, %v367_v38  ;;  %v544_v40 = vpop.f32.mrb[4].mxu1  ;;  %v342_v41 = vadd.f32 %v532_v39, %v477_v22  ;;  %v336_v43 = vpop.f32.mrb[5].mxu0 }
  0xef   : > { %v382_v42 = vadd.f32 %v544_v40, %v477_v22  ;;  %v376_v44 = vpop.f32.mrb[5].mxu1  ;;  %v337_v45 = vadd.f32 %v477_v22, %v336_v43 }
  0xf0   : > { %v377_v46 = vadd.f32 %v477_v22, %v376_v44  ;;  %401 = vst.msk [vmem:[%s666_s4 + $0x28] sm:$0xff] %vm395_vm1, %v342_v41 }
  0xf1   : > { %409 = vst.msk [vmem:[%s666_s4 + $0x68] sm:$0xff] %vm395_vm1, %v382_v42  ;;  %400 = vst.msk [vmem:[%s666_s4 + $0x20] sm:$0xff] %vm395_vm1, %v337_v45  ;;  %v535_v47 = vpop.f32.mrb[6].mxu0 }
  0xf2   : > { %408 = vst.msk [vmem:[%s666_s4 + $0x60] sm:$0xff] %vm395_vm1, %v377_v46  ;;  %v547_v48 = vpop.f32.mrb[6].mxu1  ;;  %v352_v49 = vadd.f32 %v535_v47, %v477_v22  ;;  %v346_v51 = vpop.f32.mrb[7].mxu0 }
  0xf3   : > { %v392_v50 = vadd.f32 %v547_v48, %v477_v22  ;;  %v386_v52 = vpop.f32.mrb[7].mxu1  ;;  %v347_v53 = vadd.f32 %v477_v22, %v346_v51 }
  0xf4   : > { %v387_v54 = vadd.f32 %v477_v22, %v386_v52  ;;  %403 = vst.msk [vmem:[%s666_s4 + $0x38] sm:$0xff] %vm395_vm1, %v352_v49 }
  0xf5   : > { %411 = vst.msk [vmem:[%s666_s4 + $0x78] sm:$0xff] %vm395_vm1, %v392_v50  ;;  %402 = vst.msk [vmem:[%s666_s4 + $0x30] sm:$0xff] %vm395_vm1, %v347_v53 }
  0xf6   : > { %410 = vst.msk [vmem:[%s666_s4 + $0x70] sm:$0xff] %vm395_vm1, %v387_v54 }
  0xf7 PF: > { %s13_s12 = sadd.s32 1, %s574_s12  }
  0xf8   : > { %p10_p4 = scmp.ge.s32.totalorder %s13_s12, 4  }
  0xfa   :  { %12 = sbr.rel (!%p10_p4) target bundleno = 1 (0x1), region = 62 }

</bundles_post_ra>
